<compile_context>
chip_gen: v6e
topology: v6e:2x2x1
jax: 0.10.0
libtpu: 0.0.40
codegen_flags: <defaults>
</compile_context>

<pallas_src>
import math
from functools import partial

import jax
import jax.numpy as jnp
from jax import lax
from jax.experimental import pallas as pl
from jax.experimental.pallas import tpu as pltpu

_LANES = 128
_SUBLANES = 8
_INV_SQRT2 = 1.0 / math.sqrt(2.0)

# ~4 MiB per block sits at the measured tile-size plateau (>=1 MiB tiles hit
# ~85% of HBM roofline); bigger only adds VMEM pressure.
_DEFAULT_BLOCK_BYTES = 4 * 1024 * 1024
_TARGET_STEPS = 8  # aim for >= 8 grid steps on large inputs


def _chip_has_lowp_vpu():
    """True on chips with bf16 VPU/EUP (v6e, v7x). False on v5e/v5p and older."""
    try:
        kind = jax.devices()[0].device_kind.lower()
    except Exception:
        return False
    return not any(tag in kind for tag in ("v2", "v3", "v4", "v5"))


def _gelu_kernel(x_ref, o_ref, *, use_native_tanh):
    if use_native_tanh:
        # bf16 fast path (v6e/v7x only): tanh-form GeLU in the native dtype.
        # tanh goes to the EUP slot; the few remaining muls/adds are bf16 VALU
        # ops, so the kernel stays memory-bound even at v7x's 3.2 TB/s.
        x = x_ref[...]
        dt = x.dtype
        c0 = jnp.asarray(0.7978845608028654, dt)   # sqrt(2/pi)
        c1 = jnp.asarray(0.044715, dt)
        half = jnp.asarray(0.5, dt)
        one = jnp.asarray(1.0, dt)
        inner = c0 * (x + c1 * x * x * x)
        y = half * x * (one + jnp.tanh(inner))
        o_ref[...] = y.astype(o_ref.dtype)
    else:
        # Exact erf-based GeLU in f32 — matches PyTorch MPS approximate='none'.
        # Kept for f32 inputs (parity) and for low-precision inputs on v5e
        # (no bf16 VPU/EUP there).
        x = x_ref[...].astype(jnp.float32)
        y = 0.5 * x * (1.0 + lax.erf(x * _INV_SQRT2))
        o_ref[...] = y.astype(o_ref.dtype)


def _gelu_reference(x):
    xf = x.astype(jnp.float32)
    return (0.5 * xf * (1.0 + lax.erf(xf * _INV_SQRT2))).astype(x.dtype)


def _gelu_aligned(flat, block_bytes, lane_width):
    """Run the kernel on a flat array whose length is a multiple of 128."""
    n = flat.shape[0]
    dtype = flat.dtype
    itemsize = jnp.dtype(dtype).itemsize

    # Widest lane count (multiple of 128) that divides n -> unmasked vst.
    row_elems = _LANES
    for cand in (lane_width, 256, _LANES):
        if cand % _LANES == 0 and n % cand == 0:
            row_elems = cand
            break
    n_rows = n // row_elems

    # Sublane multiple: 8 for f32, 16 for bf16/f16, 32 for int8/fp8 (packing).
    sub_mult = _SUBLANES * max(1, 4 // max(1, itemsize))

    # Rows per block: byte budget, but capped so large inputs get >= ~8 steps
    # (hides the pipeline prologue/epilogue; keeps both v7x TCs busy).
    tr_budget = max(sub_mult,
                    (block_bytes // (row_elems * itemsize)) // sub_mult * sub_mult)
    tr_steps = pl.cdiv(pl.cdiv(n_rows, _TARGET_STEPS), sub_mult) * sub_mult
    tr = min(tr_budget, tr_steps)
    if n_rows <= tr:
        # Single block covering the whole (small) array; block dim == array dim
        # is always a legal tiling regardless of sub_mult.
        tr = n_rows

    x2d = flat.reshape(n_rows, row_elems)
    grid = (pl.cdiv(n_rows, tr),)   # last block may be partial -> Pallas masks it

    # Native-low-precision compute only for bf16 on chips with bf16 VPU/EUP.
    use_native_tanh = (dtype == jnp.bfloat16) and _chip_has_lowp_vpu()

    # VMEM: 2 arrays (in/out) x 2 pipeline buffers x block + margin for Mosaic
    # internal scratch / upcast strip temporaries.
    block_bytes_actual = tr * row_elems * itemsize
    vmem_limit = max(16 * 1024 * 1024, 4 * block_bytes_actual + 8 * 1024 * 1024)

    out2d = pl.pallas_call(
        partial(_gelu_kernel, use_native_tanh=use_native_tanh),
        out_shape=jax.ShapeDtypeStruct((n_rows, row_elems), dtype),
        grid_spec=pltpu.PrefetchScalarGridSpec(
            num_scalar_prefetch=0,
            grid=grid,
            in_specs=[pl.BlockSpec((tr, row_elems), lambda i: (i, 0))],
            out_specs=pl.BlockSpec((tr, row_elems), lambda i: (i, 0)),
        ),
        compiler_params=pltpu.CompilerParams(
            dimension_semantics=("parallel",),
            vmem_limit_bytes=vmem_limit,
        ),
        cost_estimate=pl.CostEstimate(
            flops=8 * n,
            transcendentals=n,
            bytes_accessed=2 * n * itemsize,
        ),
    )(x2d)
    return out2d.reshape(-1)


def mps_gelu(x, *, block_bytes=_DEFAULT_BLOCK_BYTES, lane_width=512):
    """Elementwise exact (erf-based) GeLU via a Pallas TPU kernel.

    Preserves the input's shape and dtype.
    """
    orig_shape = x.shape
    flat = x.reshape(-1)
    n = flat.shape[0]
    if n == 0:
        return x

    if n % _LANES == 0:
        # Common path: zero wrapper-side copies (no pad, no slice).
        return _gelu_aligned(flat, block_bytes, lane_width).reshape(orig_shape)

    # Rare ragged path: kernel on the 128-aligned head, plain jnp on the
    # (< 128-element) tail, one concatenate — cheaper than pad + slice.
    n_main = n - (n % _LANES)
    tail_out = _gelu_reference(flat[n_main:])
    if n_main == 0:
        return tail_out.reshape(orig_shape)
    head_out = _gelu_aligned(flat[:n_main], block_bytes, lane_width)
    return jnp.concatenate([head_out, tail_out]).reshape(orig_shape)


if __name__ == "__main__":
    key = jax.random.PRNGKey(0)

    # Shape implied by the module's usage: NCHW activations.
    x = jax.random.normal(key, (2, 4, 16, 16), dtype=jnp.float32)
    y = jax.block_until_ready(mps_gelu(x))
    y_ref = _gelu_reference(x)
    assert y.shape == x.shape and y.dtype == x.dtype
    assert jnp.allclose(y, y_ref, atol=1e-5, rtol=1e-5)

    # Aligned case (4096 = 8 rows x 512 lanes), single unmasked block.
    x2 = jax.random.normal(jax.random.PRNGKey(1), (8, 512), dtype=jnp.float32)
    y2 = jax.block_until_ready(mps_gelu(x2))
    assert jnp.allclose(y2, _gelu_reference(x2), atol=1e-5, rtol=1e-5)

    # bf16 case: native tanh-form path on v6e/v7x, f32 exact-erf path on v5e.
    x3 = jax.random.normal(jax.random.PRNGKey(2), (4, 16, 16), dtype=jnp.bfloat16)
    y3 = jax.block_until_ready(mps_gelu(x3))
    assert y3.dtype == jnp.bfloat16 and y3.shape == x3.shape
    assert jnp.allclose(y3.astype(jnp.float32),
                        _gelu_reference(x3).astype(jnp.float32),
                        atol=2e-2, rtol=2e-2)

    # Exercises the masked partial last row-block (15 rows of 128, tr=8).
    x4 = jax.random.normal(jax.random.PRNGKey(3), (3, 5, 128), dtype=jnp.float32)
    y4 = jax.block_until_ready(mps_gelu(x4))
    assert jnp.allclose(y4, _gelu_reference(x4), atol=1e-5, rtol=1e-5)

    # Ragged tail case (130 = 128-aligned head + 2-element tail).
    x5 = jax.random.normal(jax.random.PRNGKey(4), (130,), dtype=jnp.float32)
    y5 = jax.block_until_ready(mps_gelu(x5))
    assert jnp.allclose(y5, _gelu_reference(x5), atol=1e-5, rtol=1e-5)

    print("KERNEL_OK")
</pallas_src>

<mosaic_0001>
module attributes {stable_mosaic.version = 11 : i64} {
  func.func @_gelu_kernel(%arg0: i32, %arg1: memref<4x512xf32, #tpu.memory_space<vmem>>, %arg2: memref<4x512xf32, #tpu.memory_space<vmem>>) attributes {dimension_semantics = [#tpu.dimension_semantics<parallel>], iteration_bounds = array<i64: 1>, scalar_prefetch = 0 : i64, scratch_operands = 0 : i64, tpu.core_type = #tpu.core_type<tc>, window_params = [{transform_indices = @transform_0, window_bounds = array<i64: 4, 512>}, {transform_indices = @transform_1, window_bounds = array<i64: 4, 512>}]} {
    %c0 = arith.constant 0 : index
    %c0_0 = arith.constant 0 : index
    %0 = vector.load %arg1[%c0, %c0_0] : memref<4x512xf32, #tpu.memory_space<vmem>>, vector<4x512xf32>
    %cst = arith.constant 5.000000e-01 : f32
    %1 = vector.broadcast %cst : f32 to vector<4x512xf32>
    %2 = arith.mulf %1, %0 : vector<4x512xf32>
    %cst_1 = arith.constant 0.707106769 : f32
    %3 = vector.broadcast %cst_1 : f32 to vector<4x512xf32>
    %4 = arith.mulf %0, %3 : vector<4x512xf32>
    %5 = math.erf %4 : vector<4x512xf32>
    %cst_2 = arith.constant 1.000000e+00 : f32
    %6 = vector.broadcast %cst_2 : f32 to vector<4x512xf32>
    %7 = arith.addf %6, %5 : vector<4x512xf32>
    %8 = arith.mulf %2, %7 : vector<4x512xf32>
    %c0_3 = arith.constant 0 : index
    %c0_4 = arith.constant 0 : index
    %9 = vector.load %arg2[%c0_3, %c0_4] : memref<4x512xf32, #tpu.memory_space<vmem>>, vector<4x512xf32>
    tpu.vector_store %arg2[%c0_3, %c0_4], %8 {strides = array<i32>} : memref<4x512xf32, #tpu.memory_space<vmem>>, vector<4x512xf32>,
    return
  }
  func.func @transform_0(%arg0: i32) -> (i32, i32) {
    %c0_i32 = arith.constant 0 : i32
    %c0_i32_0 = arith.constant 0 : i32
    return %arg0, %c0_i32 : i32, i32
  }
  func.func @transform_1(%arg0: i32) -> (i32, i32) {
    %c0_i32 = arith.constant 0 : i32
    %c0_i32_0 = arith.constant 0 : i32
    return %arg0, %c0_i32 : i32, i32
  }
}

</mosaic_0001>

<bundles_post_ra>
// kernel: tpu_custom_call.1
= control target key start
LH: loop header
LB: loop body
LE: loop exit
PB: predicated region body
PF: predicated region fallthrough
CT: control target
= control target key end

     0   :  { %6 = vsyncpa [#allocation3], 0  ;;  %s118_s0 = inlined_call_operand.hbm [shape: f32[4,512], index: 0, kind: input, shape index: {}]   ;;  %s119_s1 = inlined_call_operand.hbm [shape: f32[4,512], index: 1, kind: output, shape index: {}]  }
   0x1   :  { %7 = vsyncpa [#allocation4], 0  ;;  %s100_s6 = smov [#allocation2]  }
   0x2   :  { %s14_s7 = sshll.u32 %s100_s6, 4  ;;  %s15_s7 = int_to_ptr.vmem [resolvable:$true] %s14_s7 }
   0x3   :  { %s64_s8 = scalar_lea.vmem %s15_s7, 256  ;;  %p69_p1 = scmp.lt.s32.totalorder %s15_s7, %s15_s7 }
   0x4   :  { %p65_p0 = scmp.ne.s32.totalorder %s15_s7, %s64_s8  ;;  %p70_p2 = scmp.lt.s32.totalorder %s64_s8, %s64_s8 }
   0x6   :  { %p71_p3 = por %p70_p2, %p69_p1 }
   0x8   :  { %p72_p4 = pnand %p71_p3, %p65_p0 }
   0xa   :  { %75 = shalt.err (!%p72_p4)
}
   0xb   :  { %17 = dma.hbm_to_vmem [thread:$0]  %s118_s0, 256, %s15_s7, [#allocation3]  }
   0xc   :  { %96 = dma.done.wait [#allocation3], 256  }
   0xd   :  { %97 = vsyncadd [#allocation3], 4294967040  ;;  %v21_v0 = vld [vmem:[#allocation2] sm:$0xff]  ;;  %v22_v1 = vld [vmem:[#allocation2 + $0x8] sm:$0xff]  ;;  %s101_s11 = smov [#allocation5]  }
   0xe   :  { %v25_v2 = vmul.f32 0.70710677, %v21_v0  ;;  %v26_v3 = vmul.f32 0.70710677, %v22_v1  ;;  %v23_v4 = vmul.f32 0.5, %v21_v0  ;;  %v24_v6 = vmul.f32 0.5, %v22_v1 }
   0xf   :  { %s41_s12 = sshll.u32 %s101_s11, 4  ;;  %s42_s12 = int_to_ptr.vmem [resolvable:$true] %s41_s12 }
  0x10   :  { %52 = verf.f32 %v25_v2  ;;  %s76_s0 = scalar_lea.vmem %s42_s12, 256  ;;  %p81_p6 = scmp.lt.s32.totalorder %s42_s12, %s42_s12 }
  0x11   :  { %54 = verf.f32 %v26_v3  ;;  %p77_p5 = scmp.ne.s32.totalorder %s42_s12, %s76_s0  ;;  %p82_p7 = scmp.lt.s32.totalorder %s76_s0, %s76_s0 }
  0x13   :  { %p83_p8 = por %p82_p7, %p81_p6 }
  0x15   :  { %p84_p9 = pnand %p83_p8, %p77_p5 }
  0x1d   :  { %v53_v5 = vpop.eup %52 }
  0x1e   :  { %v55_v7 = vpop.eup %54  ;;  %v29_v8 = vadd.f32 1.0, %v53_v5 }
  0x1f   :  { %v30_v9 = vadd.f32 1.0, %v55_v7 }
  0x20   :  { %v31_v10 = vmul.f32 %v29_v8, %v23_v4 }
  0x21   :  { %v32_v11 = vmul.f32 %v30_v9, %v24_v6 }
  0x22   :  { %33 = vst [vmem:[#allocation5] sm:$0xff] %v31_v10 }
  0x23   :  { %34 = vst [vmem:[#allocation5 + $0x8] sm:$0xff] %v32_v11 }
  0x24   :  { %87 = shalt.err (!%p84_p9)
}
  0x25   :  { %44 = dma.vmem_to_hbm [thread:$0]  %s42_s12, 256, %s119_s1, [#allocation4]  }
  0x26   :  { %98 = dma.done.wait [#allocation4], 256  }
  0x27   :  { %99 = vsyncadd [#allocation4], 4294967040 }
  0x28   :  { %48 = vsyncpa [#allocation3], 1 }
  0x29   :  { %49 = vsyncpa [#allocation4], 1 }

</bundles_post_ra>
